<compile_context>
chip_gen: v7x
topology: tpu7x:2x2x1
jax: 0.10.0
libtpu: 0.0.40
codegen_flags: <defaults>
</compile_context>

<pallas_src>
import functools

import numpy as np
import jax
import jax.numpy as jnp
from jax import lax
from jax.experimental import pallas as pl
from jax.experimental.pallas import tpu as pltpu

PI = float(np.pi)


def _round_up(a, b):
    return -(-a // b) * b


def _cdiv(a, b):
    return -(-a // b)


# --------------------------------------------------------------------------
# Pallas kernel: one (D, TM) lane-tile of QmapApprox.forward(x) with h=None,
# processed in TMC-lane sub-chunks.
#   xT_ref    : (1, TM)      query points on the lane axis
#   freq2_ref : (2N, 1)      [freq ; freq]
#   phase2_ref: (2N, 1)      [0 ; pi/2]     (rows N..2N-1 give cos)
#   w2_ref    : (2*Dp, 2N)   rows 0..Dp-1 -> f weights, rows Dp.. -> df weights
#   w0_ref    : (Dp, 1)      constant-basis weights (zero-padded)
#   o_ref     : (D, TM)      q(x) tile, transposed (D on sublanes, M on lanes)
# --------------------------------------------------------------------------
def qmap_kernel(xT_ref, freq2_ref, phase2_ref, w2_ref, w0_ref, o_ref, *, tmc):
    freq2 = freq2_ref[...]                                 # (2N, 1)
    phase2 = phase2_ref[...]                               # (2N, 1)
    w2 = w2_ref[...]                                       # (2*Dp, 2N)
    w0 = w0_ref[...]                                       # (Dp, 1)
    Dp = w0_ref.shape[0]
    D = o_ref.shape[0]
    n_chunks = xT_ref.shape[1] // tmc                      # static

    def chunk(c, carry):
        off = pl.multiple_of(c * tmc, tmc)
        xT = xT_ref[:, pl.ds(off, tmc)]                    # (1, TMC)

        # theta rows 0..N-1 = f_n*x, rows N..2N-1 = f_n*x + pi/2
        theta = freq2 * xT + phase2                        # (2N, TMC)
        sc = jnp.sin(theta)                                # [sin(T); cos(T)]

        # Single fused MXU matmul: rows 0..Dp-1 = f (w/o const), rows Dp.. = df
        fd = jnp.dot(w2, sc, preferred_element_type=jnp.float32)  # (2*Dp, TMC)
        f = fd[:Dp, :] + w0                                # (Dp, TMC)
        df = fd[Dp:, :]                                    # (Dp, TMC)

        # q(x) = sqrt(||fa'(x)||_2) * fa(x)  ->  scale = (sum df^2) ** 0.25
        s = jnp.sum(df * df, axis=0, keepdims=True)        # (1, TMC)
        scale = jnp.sqrt(jnp.sqrt(s))

        # Store only the D real rows (lane-dense, no Dp write amplification).
        o_ref[:, pl.ds(off, tmc)] = (scale * f)[:D, :]
        return carry

    lax.fori_loop(0, n_chunks, chunk, 0)


# --------------------------------------------------------------------------
# Init-time weight folding (O(N*D) work, not per-query)
# --------------------------------------------------------------------------
def fold_qmap_weights(freqvec, w):
    """Fold Fourier weights + frequencies into the fused kernel operands."""
    N = freqvec.shape[0]
    D = w.shape[1]
    Dp = max(8, _round_up(D, 8))

    w = w.astype(jnp.float32)
    freqvec = freqvec.astype(jnp.float32)

    w0 = w[0:1, :]                       # (1, D)
    ws = w[1:1 + N, :]                   # (N, D)
    wc = w[1 + N:1 + 2 * N, :]           # (N, D)

    # f rows:  f_d  =  ws[:,d] . sin(T)  +  wc[:,d] . cos(T)
    f_rows = jnp.concatenate([ws.T, wc.T], axis=1)                        # (D, 2N)
    # df rows: df_d = -(freq*wc[:,d]) . sin(T) + (freq*ws[:,d]) . cos(T)
    df_rows = jnp.concatenate([-(wc * freqvec[:, None]).T,
                               (ws * freqvec[:, None]).T], axis=1)        # (D, 2N)

    pad = ((0, Dp - D), (0, 0))
    W2 = jnp.concatenate([jnp.pad(f_rows, pad), jnp.pad(df_rows, pad)],
                         axis=0)                                          # (2*Dp, 2N)
    w0p = jnp.pad(w0.T, ((0, Dp - D), (0, 0)))                            # (Dp, 1)

    freq2 = jnp.concatenate([freqvec, freqvec]).reshape(2 * N, 1)         # (2N, 1)
    phase2 = jnp.concatenate([jnp.zeros((N,), jnp.float32),
                              jnp.full((N,), 0.5 * PI, jnp.float32)]
                             ).reshape(2 * N, 1)                          # (2N, 1)
    return (W2.astype(jnp.float32), w0p.astype(jnp.float32),
            freq2.astype(jnp.float32), phase2.astype(jnp.float32))


# --------------------------------------------------------------------------
# Tiling policy
# --------------------------------------------------------------------------
def _choose_tiling(M, tm_target):
    M128 = _round_up(M, 128)
    # >=2 grid steps when M allows, so the parallel axis can shard across
    # v7x's 2 TensorCores; on 1-TC chips this costs only one extra step.
    min_tiles = 2 if M128 >= 256 else 1
    n_tiles = max(_cdiv(M128, tm_target), min_tiles)
    tm_eff = _round_up(_cdiv(M128, n_tiles), 128)          # last tile nearly full
    grid_n = _cdiv(M128, tm_eff)
    Mp = grid_n * tm_eff
    # Sub-chunk width for the in-kernel loop (bounds live vregs / avoids spill).
    tmc = 128
    for cand in (512, 256, 128):
        if tm_eff % cand == 0:
            tmc = cand
            break
    return tm_eff, grid_n, Mp, tmc


# --------------------------------------------------------------------------
# Wrapper
# --------------------------------------------------------------------------
def qmap_forward(x, freqvec, w, *, tm_target=2048, transpose_output=True):
    """QmapApprox.forward(x, h=None).

    x: (M, 1); freqvec: (N,); w: (1+2N, D).
    Returns (M, D) when transpose_output=True (original module layout); with
    transpose_output=False returns the lane-dense (D, M) slab directly,
    skipping a whole-output XLA transpose.
    """
    M = x.shape[0]
    N = freqvec.shape[0]
    D = w.shape[1]
    N2 = 2 * N

    W2, w0p, freq2, phase2 = fold_qmap_weights(freqvec, w)
    Dp = w0p.shape[0]

    tm_eff, grid_n, Mp, tmc = _choose_tiling(M, tm_target)

    xT = jnp.zeros((1, Mp), jnp.float32).at[0, :M].set(
        x[:, 0].astype(jnp.float32))

    cost = pl.CostEstimate(
        flops=int(2 * (2 * Dp) * N2 * Mp + 10 * Dp * Mp),
        transcendentals=int(N2 * Mp),
        bytes_accessed=int(4 * (Mp + D * Mp + int(W2.size) + int(w0p.size) + 2 * N2)),
    )

    out = pl.pallas_call(
        functools.partial(qmap_kernel, tmc=tmc),
        out_shape=jax.ShapeDtypeStruct((D, Mp), jnp.float32),
        grid=(grid_n,),
        in_specs=[
            pl.BlockSpec((1, tm_eff), lambda i: (0, i)),      # x tile (lane-dense)
            pl.BlockSpec((N2, 1), lambda i: (0, 0)),          # freq2  (resident)
            pl.BlockSpec((N2, 1), lambda i: (0, 0)),          # phase2 (resident)
            pl.BlockSpec((2 * Dp, N2), lambda i: (0, 0)),     # fused weights
            pl.BlockSpec((Dp, 1), lambda i: (0, 0)),          # w0 column
        ],
        out_specs=pl.BlockSpec((D, tm_eff), lambda i: (0, i)),
        compiler_params=pltpu.CompilerParams(
            dimension_semantics=("parallel",),
            vmem_limit_bytes=32 * 1024 * 1024),
        cost_estimate=cost,
    )(xT, freq2, phase2, W2, w0p)

    out = out[:, :M]                                        # (D, M)
    if transpose_output:
        return out.T                                        # (M, D)
    return out


# --------------------------------------------------------------------------
# Plain-JAX glue replicating FourierApprox.__init__ / find_weights + reference
# --------------------------------------------------------------------------
def eval_basis_ref(x, freqvec):
    T = x * freqvec[None, :]
    return jnp.concatenate([jnp.ones_like(x), jnp.sin(T), jnp.cos(T)], axis=1)


def fit_fourier_weights(Xtr, y, freqvec):
    B = eval_basis_ref(Xtr, freqvec)                        # (Mtr, 1+2N)
    return jnp.linalg.solve(B.T @ B, B.T @ y)               # (1+2N, D)


def qmap_reference(x, freqvec, w):
    """Pure-JAX reference of QmapApprox.forward(x, h=None)."""
    T = x * freqvec[None, :]
    B = jnp.concatenate([jnp.ones_like(x), jnp.sin(T), jnp.cos(T)], axis=1)
    dB = jnp.concatenate(
        [jnp.zeros_like(x), freqvec[None, :] * jnp.cos(T),
         -freqvec[None, :] * jnp.sin(T)], axis=1)
    f = B @ w
    df = dB @ w
    nrm = jnp.sqrt(jnp.sum(df * df, axis=-1, keepdims=True))
    return jnp.sqrt(nrm) * f

# TODO(synk): QmapApprox.forward(x, h) with h != None calls `central_differences`,
# which is not defined in the provided source; only the h=None analytic path is
# implemented.


if __name__ == "__main__":
    N = 4          # Fourier frequencies -> basis dim = 1 + 2N = 9
    D = 3          # curve embedding dimension
    Mtr = 64       # training points used to fit the weights

    key = jax.random.PRNGKey(0)
    k1, k2, k3, k4 = jax.random.split(key, 4)

    freqvec = jnp.arange(1, N + 1, dtype=jnp.float32) * 2.0 * PI   # (N,)

    # Deterministic synthetic "training data" for find_weights.
    Xtr = jnp.sort(jax.random.uniform(k1, (Mtr, 1), dtype=jnp.float32), axis=0)
    y = jax.random.normal(k2, (Mtr, D), dtype=jnp.float32)
    w = fit_fourier_weights(Xtr, y, freqvec)                        # (1+2N, D)

    # Case 1: small M -> single grid step, exercises lane padding / slicing,
    # returned in the original (M, D) layout.
    x1 = jax.random.uniform(k3, (50, 1), dtype=jnp.float32)
    out1 = jax.block_until_ready(qmap_forward(x1, freqvec, w))       # (50, D)
    ref1 = qmap_reference(x1, freqvec, w)
    np.testing.assert_allclose(np.asarray(out1), np.asarray(ref1),
                               rtol=2e-4, atol=2e-4)

    # Case 2: larger M -> multi-step grid (>=2 tiles for v7x) + in-kernel
    # sub-chunk loop; consumed in the transpose-free (D, M) layout.
    x2 = jax.random.uniform(k4, (3000, 1), dtype=jnp.float32)
    out2 = jax.block_until_ready(
        qmap_forward(x2, freqvec, w, transpose_output=False))        # (D, 3000)
    ref2 = qmap_reference(x2, freqvec, w)
    np.testing.assert_allclose(np.asarray(out2).T, np.asarray(ref2),
                               rtol=2e-4, atol=2e-4)

    print("KERNEL_OK")
</pallas_src>

<mosaic_0001>
module attributes {stable_mosaic.version = 11 : i64} {
  func.func @qmap_kernel(%arg0: i32, %arg1: memref<1x128xf32, #tpu.memory_space<vmem>>, %arg2: memref<8x1xf32, #tpu.memory_space<vmem>>, %arg3: memref<8x1xf32, #tpu.memory_space<vmem>>, %arg4: memref<16x8xf32, #tpu.memory_space<vmem>>, %arg5: memref<8x1xf32, #tpu.memory_space<vmem>>, %arg6: memref<3x128xf32, #tpu.memory_space<vmem>>) attributes {dimension_semantics = [#tpu.dimension_semantics<parallel>], iteration_bounds = array<i64: 1>, scalar_prefetch = 0 : i64, scratch_operands = 0 : i64, tpu.core_type = #tpu.core_type<tc>, window_params = [{transform_indices = @transform_0, window_bounds = array<i64: 1, 128>}, {pipeline_mode = #tpu.pipeline_mode<synchronous>, transform_indices = @transform_1, window_bounds = array<i64: 8, 1>}, {pipeline_mode = #tpu.pipeline_mode<synchronous>, transform_indices = @transform_2, window_bounds = array<i64: 8, 1>}, {pipeline_mode = #tpu.pipeline_mode<synchronous>, transform_indices = @transform_3, window_bounds = array<i64: 16, 8>}, {pipeline_mode = #tpu.pipeline_mode<synchronous>, transform_indices = @transform_4, window_bounds = array<i64: 8, 1>}, {transform_indices = @transform_5, window_bounds = array<i64: 3, 128>}]} {
    %c0 = arith.constant 0 : index
    %c0_0 = arith.constant 0 : index
    %0 = vector.load %arg2[%c0, %c0_0] : memref<8x1xf32, #tpu.memory_space<vmem>>, vector<8x1xf32>
    %c0_1 = arith.constant 0 : index
    %c0_2 = arith.constant 0 : index
    %1 = vector.load %arg3[%c0_1, %c0_2] : memref<8x1xf32, #tpu.memory_space<vmem>>, vector<8x1xf32>
    %c0_3 = arith.constant 0 : index
    %c0_4 = arith.constant 0 : index
    %2 = vector.load %arg4[%c0_3, %c0_4] : memref<16x8xf32, #tpu.memory_space<vmem>>, vector<16x8xf32>
    %c0_5 = arith.constant 0 : index
    %c0_6 = arith.constant 0 : index
    %3 = vector.load %arg5[%c0_5, %c0_6] : memref<8x1xf32, #tpu.memory_space<vmem>>, vector<8x1xf32>
    %c0_i32 = arith.constant 0 : i32
    %c128_i32 = arith.constant 128 : i32
    %4 = arith.muli %c0_i32, %c128_i32 : i32
    %5 = tpu.assume_multiple %4, 128 : i32
    %c0_7 = arith.constant 0 : index
    %6 = arith.index_cast %5 : i32 to index
    %7 = vector.load %arg1[%c0_7, %6] : memref<1x128xf32, #tpu.memory_space<vmem>>, vector<1x128xf32>
    %8 = vector.broadcast %0 : vector<8x1xf32> to vector<8x128xf32>
    %9 = vector.broadcast %7 : vector<1x128xf32> to vector<8x128xf32>
    %10 = arith.mulf %8, %9 : vector<8x128xf32>
    %11 = vector.broadcast %1 : vector<8x1xf32> to vector<8x128xf32>
    %12 = arith.addf %10, %11 : vector<8x128xf32>
    %13 = math.sin %12 : vector<8x128xf32>
    %cst = arith.constant dense<0.000000e+00> : vector<16x128xf32>
    %14 = tpu.matmul %2, %13, %cst {dimension_numbers = #tpu.dot_dimension_numbers<[1], [0], [0], [1], [0, 0, 1, 1], [], []>} : vector<16x8xf32>, vector<8x128xf32>, vector<16x128xf32> -> vector<16x128xf32>
    %15 = vector.extract_strided_slice %14 {offsets = [0, 0], sizes = [8, 128], strides = [1, 1]} : vector<16x128xf32> to vector<8x128xf32>
    %16 = vector.broadcast %3 : vector<8x1xf32> to vector<8x128xf32>
    %17 = arith.addf %15, %16 : vector<8x128xf32>
    %18 = vector.extract_strided_slice %14 {offsets = [8, 0], sizes = [8, 128], strides = [1, 1]} : vector<16x128xf32> to vector<8x128xf32>
    %19 = arith.mulf %18, %18 : vector<8x128xf32>
    %cst_8 = arith.constant dense<0.000000e+00> : vector<128xf32>
    %20 = vector.multi_reduction <add>, %19, %cst_8 [0] : vector<8x128xf32> to vector<128xf32>
    %21 = vector.shape_cast %20 : vector<128xf32> to vector<1x128xf32>
    %22 = math.sqrt %21 : vector<1x128xf32>
    %23 = math.sqrt %22 : vector<1x128xf32>
    %24 = vector.broadcast %23 : vector<1x128xf32> to vector<8x128xf32>
    %25 = arith.mulf %24, %17 : vector<8x128xf32>
    %26 = vector.extract_strided_slice %25 {offsets = [0, 0], sizes = [3, 128], strides = [1, 1]} : vector<8x128xf32> to vector<3x128xf32>
    %c0_9 = arith.constant 0 : index
    %27 = arith.index_cast %5 : i32 to index
    %28 = vector.load %arg6[%c0_9, %27] : memref<3x128xf32, #tpu.memory_space<vmem>>, vector<3x128xf32>
    tpu.vector_store %arg6[%c0_9, %27], %26 {strides = array<i32>} : memref<3x128xf32, #tpu.memory_space<vmem>>, vector<3x128xf32>,
    %c1_i32 = arith.constant 1 : i32
    return
  }
  func.func @transform_0(%arg0: i32) -> (i32, i32) {
    %c0_i32 = arith.constant 0 : i32
    %c0_i32_0 = arith.constant 0 : i32
    return %c0_i32, %arg0 : i32, i32
  }
  func.func @transform_1(%arg0: i32) -> (i32, i32) {
    %c0_i32 = arith.constant 0 : i32
    %c0_i32_0 = arith.constant 0 : i32
    %c0_i32_1 = arith.constant 0 : i32
    return %c0_i32, %c0_i32_0 : i32, i32
  }
  func.func @transform_2(%arg0: i32) -> (i32, i32) {
    %c0_i32 = arith.constant 0 : i32
    %c0_i32_0 = arith.constant 0 : i32
    %c0_i32_1 = arith.constant 0 : i32
    return %c0_i32, %c0_i32_0 : i32, i32
  }
  func.func @transform_3(%arg0: i32) -> (i32, i32) {
    %c0_i32 = arith.constant 0 : i32
    %c0_i32_0 = arith.constant 0 : i32
    %c0_i32_1 = arith.constant 0 : i32
    return %c0_i32, %c0_i32_0 : i32, i32
  }
  func.func @transform_4(%arg0: i32) -> (i32, i32) {
    %c0_i32 = arith.constant 0 : i32
    %c0_i32_0 = arith.constant 0 : i32
    %c0_i32_1 = arith.constant 0 : i32
    return %c0_i32, %c0_i32_0 : i32, i32
  }
  func.func @transform_5(%arg0: i32) -> (i32, i32) {
    %c0_i32 = arith.constant 0 : i32
    %c0_i32_0 = arith.constant 0 : i32
    return %c0_i32, %arg0 : i32, i32
  }
}

</mosaic_0001>

<bundles_post_ra>
// kernel: tpu_custom_call.1
= control target key start
LH: loop header
LB: loop body
LE: loop exit
PB: predicated region body
PF: predicated region fallthrough
CT: control target
= control target key end

     0   :  { %v335_v1 = vmov 0   ;;  %s426_s0 = inlined_call_operand.vmem [shape: f32[1,128], index: 0, kind: input, shape index: {}]   ;;  %s427_s1 = inlined_call_operand.vmem [shape: f32[8,1], index: 1, kind: input, shape index: {}]   ;;  %s428_s2 = inlined_call_operand.vmem [shape: f32[8,1], index: 2, kind: input, shape index: {}]   ;;  %s429_s3 = inlined_call_operand.vmem [shape: f32[16,8], index: 3, kind: input, shape index: {}]   ;;  %s430_s4 = inlined_call_operand.vmem [shape: f32[8,1], index: 4, kind: input, shape index: {}]   ;;  %s431_s5 = inlined_call_operand.hbm [shape: f32[3,128], index: 5, kind: output, shape index: {}]  }
   0x1   :  { %v21_v0 = vld [vmem:[%s427_s1] sm:$0xff]  ;;  %301 = vset.pattern.permute.xlu0 %v335_v1  ;;  %302 = vset.pattern.permute.xlu1 %v335_v1 }
   0x2   :  { %10 = vsyncpa [#allocation3], 0  ;;  %29 = vperm.xlu0 %301, %v21_v0   ;;  %v22_v2 = vld [vmem:[%s428_s2] sm:$0xff]  ;;  %vm149_vm0 = vcmask 64512   ;;  %v336_v21 = vmov 2102212464  }
   0x3   :  { %v23_v3 = vld [vmem:[%s429_s3] sm:$0xff]  ;;  %v337_v23 = vmov 920167782   ;;  %v338_v27 = vmov 1326507024  }
   0x4   :  { %286 = vmatprep.mubr.msk.f32.mxu0 %vm149_vm0, %v23_v3  ;;  %v25_v4 = vld [vmem:[%s430_s4] sm:$0xff]  ;;  %v339_v29 = vmov 683565275   ;;  %v340_v31 = vmov 2475754826  }
   0x5   :  { %233 = vperm.xlu1 %302, %v25_v4   ;;  %v274_v5 = vld [vmem:[%s426_s0] ss:$0 sm:$0xff]  ;;  %v341_v34 = vmov 2131351028  }
   0x6   :  { %41 = vperm.xlu0 %301, %v22_v2  }
  0x81   :  { %v30_v6 = vpop.permute.xlu0 %29 }
  0x82   :  { %v38_v7 = vmul.f32 %v274_v5, %v30_v6 }
  0x85   :  { %v42_v8 = vpop.permute.xlu0 %41 }
  0x86   :  { %v389_v9 = vadd.f32 %v42_v8, %v38_v7 }
  0x88   :  { %v48_v10 = vand.u32 2139095040, %v389_v9  ;;  %v45_v11 = vand.u32 2147483647, %v389_v9  ;;  %vm47_vm8 = vcmp.lt.s32.totalorder %v389_v9, 0  ;;  %vm137_vm13 = vweird.f32 %v389_v9 }
  0x8a   :  { %v49_v12 = vshrl.u32 %v48_v10, 23  ;;  %v52_v14 = vand.u32 8388607, %v45_v11  ;;  %vm46_vm9 = vcmp.le.f32.partialorder %v45_v11, 0.7853982 }
  0x8c   :  { %v275_v13 = vadd.s32 4294967169, %v49_v12  ;;  %v53_v17 = vor.u32 8388608, %v52_v14 }
  0x8e   :  { %v55_v15 = vadd.s32 1, %v275_v13  ;;  %v93_v25 = vshll.u32 %v53_v17, 8 }
  0x90   :  { %vm56_vm1 = vcmp.gt.s32.totalorder %v55_v15, 0 }
  0x91   :  { %v57_v16 = vsel %vm56_vm1, %v55_v15, 0 }
  0x92   :  { %v59_v18 = vand.u32 31, %v57_v16  ;;  %v58_v19 = vshrl.u32 %v57_v16, 5 }
  0x94   :  { %v60_v20 = vsub.s32 32, %v59_v18  ;;  %v71_v22 = vshll.u32 %v336_v21, %v59_v18  ;;  %v74_v24 = vshll.u32 %v337_v23, %v59_v18  ;;  %v62_v30 = vshll.u32 %v339_v29, %v59_v18 }
  0x95   :  { %v65_v33 = vshll.u32 %v340_v31, %v59_v18  ;;  %v68_v36 = vshll.u32 %v341_v34, %v59_v18  ;;  %vm80_vm2 = vcmp.lt.s32.totalorder %v58_v19, 4  ;;  %vm77_vm3 = vcmp.lt.s32.totalorder %v58_v19, 1 }
  0x96   :  { %v72_v26 = vshrl.u32 %v337_v23, %v60_v20  ;;  %v75_v28 = vshrl.u32 %v338_v27, %v60_v20  ;;  %v63_v32 = vshrl.u32 %v340_v31, %v60_v20  ;;  %v66_v35 = vshrl.u32 %v341_v34, %v60_v20 }
  0x97   :  { %v69_v37 = vshrl.u32 %v336_v21, %v60_v20  ;;  %v61_v41 = vshrl.u32 %v339_v29, %v60_v20  ;;  %vm78_vm4 = vcmp.lt.s32.totalorder %v58_v19, 2  ;;  %vm79_vm5 = vcmp.lt.s32.totalorder %v58_v19, 3 }
  0x98   :  { %v73_v38 = vor.u32 %v72_v26, %v71_v22  ;;  %v76_v39 = vor.u32 %v75_v28, %v74_v24  ;;  %v64_v40 = vor.u32 %v63_v32, %v62_v30  ;;  %v67_v42 = vor.u32 %v66_v35, %v65_v33 }
  0x99   :  { %v70_v43 = vor.u32 %v69_v37, %v68_v36 }
  0x9a   :  { %v86_v44 = vsel %vm80_vm2, %v73_v38, 920167782  ;;  %v90_v45 = vsel %vm80_vm2, %v76_v39, 1326507024  ;;  %v85_v47 = vsel %vm77_vm3, %v64_v40, %v67_v42  ;;  %v81_v50 = vsel %vm77_vm3, %v61_v41, %v64_v40 }
  0x9b   :  { %v82_v46 = vsel %vm80_vm2, %v70_v43, 2102212464  ;;  %v87_v48 = vsel %vm79_vm5, %v70_v43, %v86_v44  ;;  %v89_v49 = vsel %vm77_vm3, %v67_v42, %v70_v43  ;;  %v91_v53 = vsel %vm79_vm5, %v73_v38, %v90_v45  ;;  %v24_v38 = vld [vmem:[%s429_s3 + $0x8] sm:$0xff]  ;;  %s342_s3 = smov [#allocation2]  }
  0x9c   :  { %v83_v51 = vsel %vm79_vm5, %v67_v42, %v82_v46  ;;  %v88_v52 = vsel %vm78_vm4, %v85_v47, %v87_v48  ;;  %v92_v54 = vsel %vm78_vm4, %v89_v49, %v91_v53  ;;  %v234_v53 = vpop.permute.xlu1 %233  ;;  %s266_s4 = sshll.u32 %s342_s3, 4  ;;  %s267_s4 = int_to_ptr.vmem [resolvable:$true] %s266_s4 }
  0x9d   :  { %v395_v55 = vmul.u32.u64.low %v93_v25, %v88_v52  ;;  %v396_v56 = vmul.u32.u64.high %v93_v25, %v88_v52, %v395_v55  ;;  %v398_v57 = vmul.u32.u64.low %v93_v25, %v92_v54  ;;  %v399_v58 = vmul.u32.u64.high %v93_v25, %v92_v54, %v398_v57  ;;  %s311_s27 = scalar_lea.vmem %s267_s4, 64  ;;  %p316_p1 = scmp.lt.s32.totalorder %s267_s4, %s267_s4 }
  0x9e   :  { %v84_v59 = vsel %vm78_vm4, %v81_v50, %v83_v51  ;;  %p312_p0 = scmp.ne.s32.totalorder %s267_s4, %s311_s27  ;;  %p317_p2 = scmp.lt.s32.totalorder %s311_s27, %s311_s27 }
  0x9f   :  { %v103_v60 = vadd.s32 1, %v396_v56  ;;  %v100_v61 = vmul.u32 %v93_v25, %v84_v59  ;;  %vm102_vm6 = vc.u32 %v399_v58, %v395_v55  ;;  %v101_v10 = vadd.s32 %v395_v55, %v399_v58 }
  0xa0   :  { %p318_p3 = por %p317_p2, %p316_p1 }
  0xa1   :  { %v104_v62 = vsel %vm102_vm6, %v103_v60, %v396_v56 }
  0xa2   :  { %v105_v63 = vadd.s32 %v104_v62, %v100_v61  ;;  %p319_p4 = pnand %p318_p3, %p312_p0 }
  0xa4   :  { %v106_v0 = vadd.s32 536870912, %v105_v63 }
  0xa6   :  { %v107_v1 = vshrl.u32 %v106_v0, 30 }
  0xa8   :  { %v108_v2 = vshll.u32 %v107_v1, 30  ;;  %v131_v23 = vsub.s32 4, %v107_v1 }
  0xaa   :  { %v109_v3 = vsub.s32 %v105_v63, %v108_v2  ;;  %v132_v26 = vsel %vm47_vm8, %v131_v23, %v107_v1 }
  0xab   :  { %v134_v28 = vsel %vm46_vm9, 0, %v132_v26 }
  0xac   :  { %v111_v4 = vsub.s32 0, %v109_v3  ;;  %v138_v29 = vadd.s32 3, %v134_v28 }
  0xae   :  { %v276_v5 = vmin.u32 %v111_v4, %v109_v3  ;;  %v139_v30 = vand.u32 3, %v138_v29 }
  0xb0   :  { %v113_v6 = vclz %v276_v5  ;;  %vm144_vm10 = vcmp.eq.s32.totalorder %v139_v30, 2  ;;  %vm141_vm11 = vcmp.eq.s32.totalorder %v139_v30, 0  ;;  %vm140_vm12 = vcmp.lt.s32.totalorder %v139_v30, 2 }
  0xb2   :  { %v277_v7 = vadd.s32 4294967294, %v113_v6 }
  0xb4   :  { %vm278_vm7 = vcmp.lt.s32.totalorder %v277_v7, 0 }
  0xb5   :  { %v116_v8 = vsel %vm278_vm7, 0, %v277_v7 }
  0xb6   :  { %v117_v12 = vsub.s32 32, %v116_v8  ;;  %v121_v13 = vsub.s32 4294967266, %v116_v8  ;;  %v118_v14 = vshll.u32 %v109_v3, %v116_v8 }
  0xb8   :  { %v119_v15 = vshrl.u32 %v101_v10, %v117_v12  ;;  %v122_v16 = vadd.s32 127, %v121_v13 }
  0xba   :  { %v120_v17 = vor.u32 %v119_v15, %v118_v14  ;;  %v123_v18 = vshll.u32 %v122_v16, 23 }
  0xbc   :  { %v124_v19 = vor.u32 4788187, %v123_v18  ;;  %v127_v21 = vcvt.s32.f32 %v120_v17 }
  0xbe   :  { %v125_v20 = vand.u32 2147483647, %v124_v19 }
  0xc0   :  { %v128_v22 = vmul.f32 %v127_v21, %v125_v20 }
  0xc2   :  { %v129_v24 = vxor.u32 2147483648, %v128_v22 }
  0xc4   :  { %v130_v25 = vsel %vm47_vm8, %v129_v24, %v128_v22 }
  0xc5   :  { %v133_v27 = vsel %vm46_vm9, %v389_v9, %v130_v25 }
  0xc6   :  { %303 = vcosq.f32 %v133_v27 }
  0xc7   :  { %305 = vsinq.f32 %v133_v27 }
  0xd0   :  { %v304_v31 = vpop.eup %303 }
  0xd1   :  { %v306_v32 = vpop.eup %305  ;;  %v145_v33 = vxor.u32 2147483648, %v304_v31 }
  0xd2   :  { %v142_v34 = vxor.u32 2147483648, %v306_v32 }
  0xd3   :  { %v146_v35 = vsel %vm144_vm10, %v145_v33, %v306_v32 }
  0xd4   :  { %v143_v36 = vsel %vm141_vm11, %v304_v31, %v142_v34 }
  0xd5   :  { %v147_v11 = vsel %vm140_vm12, %v143_v36, %v146_v35 }
  0xd6   :  { %v148_v37 = vsel %vm137_vm13, nan, %v147_v11 }
  0xd7   :  { %284 = vmatprep.subr.mxu0 %v148_v37 }
  0xd8   :  { %285 = vmatpush3.msra.mxu0 %v148_v37 }
  0xd9   :  { %287 = vmatmul.mubr.msk.f32.vlgmr.msra.gmra.mrb[0].mxu0 %vm149_vm0, %v24_v38 }
 0x1ac   :  { %v288_v39 = vpop.f32.mrb[0].mxu0 }
 0x1ad   :  { %v237_v40 = vmul.f32 %v288_v39, %v288_v39  ;;  %v222_v41 = vpop.f32.mrb[1].mxu0 }
 0x1ae   :  { %v236_v56 = vadd.f32 %v234_v53, %v222_v41 }
 0x1af   :  { %v238_v42 = vrot.slane %v237_v40, 4 }
 0x1b1   :  { %v239_v43 = vadd.f32 %v238_v42, %v237_v40 }
 0x1b3   :  { %v240_v44 = vrot.slane %v239_v43, 2 }
 0x1b5   :  { %v241_v45 = vadd.f32 %v240_v44, %v239_v43 }
 0x1b7   :  { %v242_v46 = vrot.slane %v241_v45, 1 }
 0x1b9   :  { %v243_v47 = vadd.f32 %v242_v46, %v241_v45 }
 0x1bb   :  { %307 = vrsqrt.f32 %v243_v47  ;;  %vm246_vm14 = vcmp.eq.f32.partialorder %v243_v47, inf  ;;  %v249_v49 = vand.u32 2147483648, %v243_v47  ;;  %vm248_vm15 = vcmp.eq.f32.partialorder %v243_v47, 0.0 }
 0x1c5   :  { %v308_v9 = vpop.eup %307 }
 0x1c6   :  { %v245_v48 = vmul.f32 %v308_v9, %v243_v47 }
 0x1c8   :  { %v247_v50 = vsel %vm246_vm14, %v243_v47, %v245_v48 }
 0x1c9   :  { %v250_v51 = vsel %vm248_vm15, %v249_v49, %v247_v50 }
 0x1ca   :  { %309 = vrsqrt.f32 %v250_v51  ;;  %vm253_vm0 = vcmp.eq.f32.partialorder %v250_v51, inf  ;;  %v256_v55 = vand.u32 2147483648, %v250_v51  ;;  %vm255_vm1 = vcmp.eq.f32.partialorder %v250_v51, 0.0 }
 0x1d4   :  { %v310_v52 = vpop.eup %309 }
 0x1d5   :  { %v252_v54 = vmul.f32 %v310_v52, %v250_v51 }
 0x1d7   :  { %v254_v57 = vsel %vm253_vm0, %v250_v51, %v252_v54 }
 0x1d8   :  { %v257_v58 = vsel %vm255_vm1, %v256_v55, %v254_v57 }
 0x1d9   :  { %v258_v59 = vmul.f32 %v257_v58, %v236_v56 }
 0x1db   :  { %259 = vst [vmem:[#allocation2] sm:$0x7] %v258_v59 }
 0x1dc   :  { %322 = shalt.err (!%p319_p4)
}
 0x1dd   :  { %s323_s30 = scalar_lea.hbm %s431_s5, 64 }
 0x1de   :  { %p324_p5 = scmp.ne.s32.totalorder %s431_s5, %s323_s30  ;;  %p327_p6 = scmp.lt.u32.totalorder %s323_s30, %s431_s5 }
 0x1e0   :  { %p329_p7 = pnand %p327_p6, %p324_p5 }
 0x1e2   :  { %332 = shalt.err (!%p329_p7)
}
 0x1e3   :  { %269 = dma.vmem_to_hbm [thread:$0]  %s267_s4, 64, %s431_s5, [#allocation3]  }
 0x1e4   :  { %333 = dma.done.wait [#allocation3], 64  }
 0x1e5   :  { %334 = vsyncadd [#allocation3], 4294967232 }
 0x1e6   :  { %273 = vsyncpa [#allocation3], 1 }

</bundles_post_ra>
